<compile_context>
chip_gen: v6e
topology: v6e:2x2x1
jax: 0.10.0
libtpu: 0.0.40
codegen_flags: <defaults>
</compile_context>

<pallas_src>
import math

import jax
import jax.numpy as jnp
from jax.experimental import pallas as pl
from jax.experimental.pallas import tpu as pltpu


def _lstm_gen_kernel(x_ref, wih_ref, whh_ref, b_ref, wfc_ref, bfc_ref, y_ref):
    """Single-invocation LSTM + Linear forward.

    x_ref  : (S, B, Z)  time-major input sequence, f32
    wih_ref: (Z, 4H)    input->gates weight, PyTorch gate order [i, f, g, o],
                        sigmoid-gate columns pre-scaled by 0.5, bf16
    whh_ref: (H, 4H)    hidden->gates weight, same order/scaling, f32
    b_ref  : (1, 4H)    combined bias (b_ih + b_hh), sigmoid lanes pre-scaled, f32
    wfc_ref: (H, O)     fc weight, bf16
    bfc_ref: (1, O)     fc bias, f32
    y_ref  : (S, B, O)  time-major output sequence, f32
    """
    S, B, Z = x_ref.shape
    H = whh_ref.shape[0]
    G = 4 * H
    O = wfc_ref.shape[1]

    # ---- Phase 0: hoisted input projection for ALL timesteps (one MXU pass) --------
    x_all = x_ref[...].reshape(S * B, Z).astype(wih_ref.dtype)
    xg = (jnp.dot(x_all, wih_ref[...], preferred_element_type=jnp.float32)
          + b_ref[...])                                    # (S*B, 4H) f32, time-major

    # Per-lane activation constants (computed once, hoisted out of the loop):
    #   sigmoid lanes (i, f, o): act = 0.5*tanh + 0.5 ;  g lanes: act = tanh
    lane = jax.lax.broadcasted_iota(jnp.int32, (1, G), 1)
    is_g = jnp.logical_and(lane >= 2 * H, lane < 3 * H)
    act_a = jnp.broadcast_to(jnp.where(is_g, 1.0, 0.5).astype(jnp.float32), (B, G))
    act_b = jnp.broadcast_to(jnp.where(is_g, 0.0, 0.5).astype(jnp.float32), (B, G))

    w_hh = whh_ref[...]                                    # (H, 4H) f32, resident

    # ---- Phase 1: recurrence, fully unrolled (static slices, one matmul per step) ---
    h = jnp.zeros((B, H), jnp.float32)
    c = jnp.zeros((B, H), jnp.float32)
    hs = []
    for t in range(S):
        gates = (xg[t * B:(t + 1) * B, :]
                 + jnp.dot(h, w_hh, preferred_element_type=jnp.float32))   # (B, 4H)
        tg = jnp.tanh(gates)                       # single full-width EUP pass
        act = act_a * tg + act_b                   # sigmoid/tanh per lane via fma
        i_g = act[:, 0 * H:1 * H]
        f_g = act[:, 1 * H:2 * H]
        g_g = act[:, 2 * H:3 * H]
        o_g = act[:, 3 * H:4 * H]
        c = f_g * c + i_g * g_g
        h = o_g * jnp.tanh(c)
        hs.append(h)                               # stays in vregs (~2 KB total)

    # ---- Phase 2: hoisted output projection + one bulk store ------------------------
    hs_all = jnp.concatenate(hs, axis=0)           # (S*B, H) time-major, leading-dim concat
    y = (jnp.dot(hs_all.astype(wfc_ref.dtype), wfc_ref[...],
                 preferred_element_type=jnp.float32)
         + bfc_ref[...])                           # (S*B, O) f32
    y_ref[...] = y.reshape(S, B, O).astype(y_ref.dtype)


def generator_forward(z, params):
    """z: (B, S, z_dim) f32 -> (B, S, output_dim) f32 (batch-first, like PyTorch)."""
    B, S, Z = z.shape
    H = params["w_hh"].shape[0]
    O = params["w_fc"].shape[1]
    G = 4 * H

    # Tiny layout plumbing off the serial path: present the kernel with time-major rows.
    z_tm = jnp.transpose(z, (1, 0, 2))             # (S, B, Z)

    nbytes = lambda a: a.size * a.dtype.itemsize
    cost = pl.CostEstimate(
        flops=2 * S * B * (Z * G + H * G + H * O) + 12 * S * B * G,
        transcendentals=S * B * (G + H),
        bytes_accessed=int(nbytes(z_tm) + nbytes(params["w_ih"]) + nbytes(params["w_hh"])
                           + nbytes(params["bias"]) + nbytes(params["w_fc"])
                           + nbytes(params["b_fc"]) + S * B * O * 4),
    )

    y_tm = pl.pallas_call(
        _lstm_gen_kernel,
        out_shape=jax.ShapeDtypeStruct((S, B, O), jnp.float32),
        # No grid: all operands (a few KB) are VMEM-resident for the single invocation,
        # so there is no per-step pipeline overhead and no double-buffering.
        in_specs=[pl.BlockSpec(memory_space=pltpu.MemorySpace.VMEM)] * 6,
        out_specs=pl.BlockSpec(memory_space=pltpu.MemorySpace.VMEM),
        cost_estimate=cost,
    )(z_tm, params["w_ih"], params["w_hh"], params["bias"], params["w_fc"], params["b_fc"])

    return jnp.transpose(y_tm, (1, 0, 2))          # back to batch-first (B, S, O)


def init_raw_params(key, z_dim, hidden_dim, output_dim):
    """PyTorch-layout f32 parameters (weight_ih_l0, weight_hh_l0, biases, fc)."""
    H = hidden_dim
    ks = jax.random.split(key, 6)
    bound = 1.0 / math.sqrt(H)
    u = lambda k, shape: jax.random.uniform(k, shape, jnp.float32, -bound, bound)
    return {
        "w_ih": u(ks[0], (4 * H, z_dim)),   # gate order [i, f, g, o]
        "w_hh": u(ks[1], (4 * H, H)),
        "b_ih": u(ks[2], (4 * H,)),
        "b_hh": u(ks[3], (4 * H,)),
        "w_fc": u(ks[4], (output_dim, H)),
        "b_fc": u(ks[5], (output_dim,)),
    }


def pack_params(raw, matmul_dtype=jnp.bfloat16):
    """Kernel layout: pre-transpose for row-major x@W, fold the two LSTM biases, and
    pre-scale the sigmoid-gate (i, f, o) rows by 0.5 so the kernel's single tanh pass
    yields sigmoid(x) = 0.5*(1 + tanh(x/2)) with one per-lane fma.  W_hh stays f32 so
    the serial h->h chain has no per-step cast; the hoisted bulk-matmul weights
    (W_ih, W_fc) are bf16.  The 0.5 scaling is exact in f32 and bf16."""
    H = raw["w_hh"].shape[1]
    O = raw["w_fc"].shape[0]
    scale = jnp.concatenate([jnp.full((2 * H,), 0.5, jnp.float32),   # i, f  -> sigmoid
                             jnp.ones((H,), jnp.float32),            # g     -> tanh
                             jnp.full((H,), 0.5, jnp.float32)])      # o     -> sigmoid
    return {
        "w_ih": (raw["w_ih"] * scale[:, None]).T.astype(matmul_dtype),           # (Z, 4H)
        "w_hh": (raw["w_hh"] * scale[:, None]).T.astype(jnp.float32),            # (H, 4H)
        "bias": ((raw["b_ih"] + raw["b_hh"]) * scale).reshape(1, 4 * H).astype(jnp.float32),
        "w_fc": raw["w_fc"].T.astype(matmul_dtype),                              # (H, O)
        "b_fc": raw["b_fc"].reshape(1, O).astype(jnp.float32),
    }


def _reference_matched(z, kp):
    """Pure-JAX reference with the kernel's precision policy and tanh-sigmoid form."""
    B, S, Z = z.shape
    H = kp["w_hh"].shape[0]
    x_tm = jnp.transpose(z, (1, 0, 2)).reshape(S * B, Z).astype(kp["w_ih"].dtype)
    xg = (jnp.dot(x_tm, kp["w_ih"], preferred_element_type=jnp.float32)
          + kp["bias"]).reshape(S, B, 4 * H)

    def step(carry, xg_t):
        h, c = carry
        gates = xg_t + jnp.dot(h, kp["w_hh"], preferred_element_type=jnp.float32)
        t = jnp.tanh(gates)
        i = 0.5 * (1.0 + t[:, 0 * H:1 * H])
        f = 0.5 * (1.0 + t[:, 1 * H:2 * H])
        g = t[:, 2 * H:3 * H]
        o = 0.5 * (1.0 + t[:, 3 * H:4 * H])
        c = f * c + i * g
        h = o * jnp.tanh(c)
        return (h, c), h

    h0 = jnp.zeros((B, H), jnp.float32)
    c0 = jnp.zeros((B, H), jnp.float32)
    _, hs = jax.lax.scan(step, (h0, c0), xg)                         # (S, B, H)
    hs = hs.reshape(S * B, H).astype(kp["w_fc"].dtype)
    y = jnp.dot(hs, kp["w_fc"], preferred_element_type=jnp.float32) + kp["b_fc"]
    return jnp.transpose(y.reshape(S, B, -1), (1, 0, 2))


def _reference_f32(z, raw):
    """Standard-form (sigmoid) full-f32 LSTM + Linear — exact PyTorch semantics."""
    B, S, Z = z.shape
    H = raw["w_hh"].shape[1]
    w_ih = raw["w_ih"].T
    w_hh = raw["w_hh"].T
    bias = raw["b_ih"] + raw["b_hh"]

    def step(carry, x_t):
        h, c = carry
        gates = x_t @ w_ih + h @ w_hh + bias
        i = jax.nn.sigmoid(gates[:, 0 * H:1 * H])
        f = jax.nn.sigmoid(gates[:, 1 * H:2 * H])
        g = jnp.tanh(gates[:, 2 * H:3 * H])
        o = jax.nn.sigmoid(gates[:, 3 * H:4 * H])
        c = f * c + i * g
        h = o * jnp.tanh(c)
        return (h, c), h

    h0 = jnp.zeros((B, H), jnp.float32)
    c0 = jnp.zeros((B, H), jnp.float32)
    _, hs = jax.lax.scan(step, (h0, c0), jnp.transpose(z, (1, 0, 2)))   # (S, B, H)
    hs = jnp.transpose(hs, (1, 0, 2))                                    # (B, S, H)
    return hs @ raw["w_fc"].T + raw["b_fc"]


if __name__ == "__main__":
    # Shapes consistent with Generator(z_dim, hidden_dim, output_dim):
    # z: (batch=2, seq=8, z_dim=4), hidden_dim=32, output_dim=4
    B, S, Z, H, O = 2, 8, 4, 32, 4

    key = jax.random.PRNGKey(0)
    k_param, k_input = jax.random.split(key)
    raw = init_raw_params(k_param, Z, H, O)
    params = pack_params(raw, matmul_dtype=jnp.bfloat16)
    z = jax.random.normal(k_input, (B, S, Z), dtype=jnp.float32)

    fwd = jax.jit(generator_forward)
    out = jax.block_until_ready(fwd(z, params))
    assert out.shape == (B, S, O), out.shape

    # Tight check vs. a precision-matched reference (same packed weights, same
    # tanh-based sigmoid formulation, f32 accumulation).
    ref_m = jax.block_until_ready(_reference_matched(z, params))
    err_m = float(jnp.max(jnp.abs(out - ref_m)))
    assert jnp.allclose(out, ref_m, atol=2e-3, rtol=2e-3), err_m

    # Loose semantic check vs. a full-f32 standard-sigmoid reference on the raw
    # (unscaled, untransposed) weights — bounds the bf16 matmul-input rounding.
    ref32 = jax.block_until_ready(_reference_f32(z, raw))
    err32 = float(jnp.max(jnp.abs(out - ref32)))
    assert jnp.allclose(out, ref32, atol=5e-2, rtol=5e-2), err32

    print("KERNEL_OK")
</pallas_src>

<mosaic_0001>
module attributes {stable_mosaic.version = 11 : i64} {
  func.func @_lstm_gen_kernel(%arg0: memref<8x2x4xf32, #tpu.memory_space<vmem>>, %arg1: memref<4x128xbf16, #tpu.memory_space<vmem>>, %arg2: memref<32x128xf32, #tpu.memory_space<vmem>>, %arg3: memref<1x128xf32, #tpu.memory_space<vmem>>, %arg4: memref<32x4xbf16, #tpu.memory_space<vmem>>, %arg5: memref<1x4xf32, #tpu.memory_space<vmem>>, %arg6: memref<8x2x4xf32, #tpu.memory_space<vmem>>) attributes {dimension_semantics = [], scalar_prefetch = 0 : i64, scratch_operands = 0 : i64, tpu.core_type = #tpu.core_type<tc>} {
    %c0 = arith.constant 0 : index
    %c0_0 = arith.constant 0 : index
    %c0_1 = arith.constant 0 : index
    %0 = vector.load %arg0[%c0, %c0_0, %c0_1] : memref<8x2x4xf32, #tpu.memory_space<vmem>>, vector<8x2x4xf32>
    %1 = vector.shape_cast %0 : vector<8x2x4xf32> to vector<16x4xf32>
    %2 = arith.truncf %1 : vector<16x4xf32> to vector<16x4xbf16>
    %c0_2 = arith.constant 0 : index
    %c0_3 = arith.constant 0 : index
    %3 = vector.load %arg1[%c0_2, %c0_3] : memref<4x128xbf16, #tpu.memory_space<vmem>>, vector<4x128xbf16>
    %cst = arith.constant dense<0.000000e+00> : vector<16x128xf32>
    %4 = tpu.matmul %2, %3, %cst {dimension_numbers = #tpu.dot_dimension_numbers<[1], [0], [0], [1], [0, 0, 1, 1], [], []>} : vector<16x4xbf16>, vector<4x128xbf16>, vector<16x128xf32> -> vector<16x128xf32>
    %c0_4 = arith.constant 0 : index
    %c0_5 = arith.constant 0 : index
    %5 = vector.load %arg3[%c0_4, %c0_5] : memref<1x128xf32, #tpu.memory_space<vmem>>, vector<1x128xf32>
    %6 = vector.broadcast %5 : vector<1x128xf32> to vector<16x128xf32>
    %7 = arith.addf %4, %6 : vector<16x128xf32>
    %8 = tpu.iota {dimensions = array<i32: 1>} : vector<1x128xi32>
    %c64_i32 = arith.constant 64 : i32
    %9 = vector.broadcast %c64_i32 : i32 to vector<1x128xi32>
    %10 = arith.cmpi sge, %8, %9 : vector<1x128xi32>
    %c96_i32 = arith.constant 96 : i32
    %11 = vector.broadcast %c96_i32 : i32 to vector<1x128xi32>
    %12 = arith.cmpi slt, %8, %11 : vector<1x128xi32>
    %13 = arith.andi %10, %12 : vector<1x128xi1>
    %cst_6 = arith.constant 1.000000e+00 : f32
    %cst_7 = arith.constant 5.000000e-01 : f32
    %14 = vector.broadcast %cst_6 : f32 to vector<1x128xf32>
    %15 = vector.broadcast %cst_7 : f32 to vector<1x128xf32>
    %16 = arith.select %13, %14, %15 : vector<1x128xi1>, vector<1x128xf32>
    %17 = vector.shape_cast %16 : vector<1x128xf32> to vector<1x128xf32>
    %18 = vector.broadcast %17 : vector<1x128xf32> to vector<2x128xf32>
    %cst_8 = arith.constant 0.000000e+00 : f32
    %cst_9 = arith.constant 5.000000e-01 : f32
    %19 = vector.broadcast %cst_8 : f32 to vector<1x128xf32>
    %20 = vector.broadcast %cst_9 : f32 to vector<1x128xf32>
    %21 = arith.select %13, %19, %20 : vector<1x128xi1>, vector<1x128xf32>
    %22 = vector.shape_cast %21 : vector<1x128xf32> to vector<1x128xf32>
    %23 = vector.broadcast %22 : vector<1x128xf32> to vector<2x128xf32>
    %c0_10 = arith.constant 0 : index
    %c0_11 = arith.constant 0 : index
    %24 = vector.load %arg2[%c0_10, %c0_11] : memref<32x128xf32, #tpu.memory_space<vmem>>, vector<32x128xf32>
    %cst_12 = arith.constant 0.000000e+00 : f32
    %25 = vector.broadcast %cst_12 : f32 to vector<2x32xf32>
    %cst_13 = arith.constant 0.000000e+00 : f32
    %26 = vector.broadcast %cst_13 : f32 to vector<2x32xf32>
    %27 = vector.extract_strided_slice %7 {offsets = [0, 0], sizes = [2, 128], strides = [1, 1]} : vector<16x128xf32> to vector<2x128xf32>
    %cst_14 = arith.constant dense<0.000000e+00> : vector<2x128xf32>
    %28 = tpu.matmul %25, %24, %cst_14 {dimension_numbers = #tpu.dot_dimension_numbers<[1], [0], [0], [1], [0, 0, 1, 1], [], []>} : vector<2x32xf32>, vector<32x128xf32>, vector<2x128xf32> -> vector<2x128xf32>
    %29 = arith.addf %27, %28 : vector<2x128xf32>
    %30 = math.tanh %29 : vector<2x128xf32>
    %31 = arith.mulf %18, %30 : vector<2x128xf32>
    %32 = arith.addf %31, %23 : vector<2x128xf32>
    %33 = vector.extract_strided_slice %32 {offsets = [0, 0], sizes = [2, 32], strides = [1, 1]} : vector<2x128xf32> to vector<2x32xf32>
    %34 = vector.extract_strided_slice %32 {offsets = [0, 32], sizes = [2, 32], strides = [1, 1]} : vector<2x128xf32> to vector<2x32xf32>
    %35 = vector.extract_strided_slice %32 {offsets = [0, 64], sizes = [2, 32], strides = [1, 1]} : vector<2x128xf32> to vector<2x32xf32>
    %36 = vector.extract_strided_slice %32 {offsets = [0, 96], sizes = [2, 32], strides = [1, 1]} : vector<2x128xf32> to vector<2x32xf32>
    %37 = arith.mulf %34, %26 : vector<2x32xf32>
    %38 = arith.mulf %33, %35 : vector<2x32xf32>
    %39 = arith.addf %37, %38 : vector<2x32xf32>
    %40 = math.tanh %39 : vector<2x32xf32>
    %41 = arith.mulf %36, %40 : vector<2x32xf32>
    %42 = vector.extract_strided_slice %7 {offsets = [2, 0], sizes = [2, 128], strides = [1, 1]} : vector<16x128xf32> to vector<2x128xf32>
    %cst_15 = arith.constant dense<0.000000e+00> : vector<2x128xf32>
    %43 = tpu.matmul %41, %24, %cst_15 {dimension_numbers = #tpu.dot_dimension_numbers<[1], [0], [0], [1], [0, 0, 1, 1], [], []>} : vector<2x32xf32>, vector<32x128xf32>, vector<2x128xf32> -> vector<2x128xf32>
    %44 = arith.addf %42, %43 : vector<2x128xf32>
    %45 = math.tanh %44 : vector<2x128xf32>
    %46 = arith.mulf %18, %45 : vector<2x128xf32>
    %47 = arith.addf %46, %23 : vector<2x128xf32>
    %48 = vector.extract_strided_slice %47 {offsets = [0, 0], sizes = [2, 32], strides = [1, 1]} : vector<2x128xf32> to vector<2x32xf32>
    %49 = vector.extract_strided_slice %47 {offsets = [0, 32], sizes = [2, 32], strides = [1, 1]} : vector<2x128xf32> to vector<2x32xf32>
    %50 = vector.extract_strided_slice %47 {offsets = [0, 64], sizes = [2, 32], strides = [1, 1]} : vector<2x128xf32> to vector<2x32xf32>
    %51 = vector.extract_strided_slice %47 {offsets = [0, 96], sizes = [2, 32], strides = [1, 1]} : vector<2x128xf32> to vector<2x32xf32>
    %52 = arith.mulf %49, %39 : vector<2x32xf32>
    %53 = arith.mulf %48, %50 : vector<2x32xf32>
    %54 = arith.addf %52, %53 : vector<2x32xf32>
    %55 = math.tanh %54 : vector<2x32xf32>
    %56 = arith.mulf %51, %55 : vector<2x32xf32>
    %57 = vector.extract_strided_slice %7 {offsets = [4, 0], sizes = [2, 128], strides = [1, 1]} : vector<16x128xf32> to vector<2x128xf32>
    %cst_16 = arith.constant dense<0.000000e+00> : vector<2x128xf32>
    %58 = tpu.matmul %56, %24, %cst_16 {dimension_numbers = #tpu.dot_dimension_numbers<[1], [0], [0], [1], [0, 0, 1, 1], [], []>} : vector<2x32xf32>, vector<32x128xf32>, vector<2x128xf32> -> vector<2x128xf32>
    %59 = arith.addf %57, %58 : vector<2x128xf32>
    %60 = math.tanh %59 : vector<2x128xf32>
    %61 = arith.mulf %18, %60 : vector<2x128xf32>
    %62 = arith.addf %61, %23 : vector<2x128xf32>
    %63 = vector.extract_strided_slice %62 {offsets = [0, 0], sizes = [2, 32], strides = [1, 1]} : vector<2x128xf32> to vector<2x32xf32>
    %64 = vector.extract_strided_slice %62 {offsets = [0, 32], sizes = [2, 32], strides = [1, 1]} : vector<2x128xf32> to vector<2x32xf32>
    %65 = vector.extract_strided_slice %62 {offsets = [0, 64], sizes = [2, 32], strides = [1, 1]} : vector<2x128xf32> to vector<2x32xf32>
    %66 = vector.extract_strided_slice %62 {offsets = [0, 96], sizes = [2, 32], strides = [1, 1]} : vector<2x128xf32> to vector<2x32xf32>
    %67 = arith.mulf %64, %54 : vector<2x32xf32>
    %68 = arith.mulf %63, %65 : vector<2x32xf32>
    %69 = arith.addf %67, %68 : vector<2x32xf32>
    %70 = math.tanh %69 : vector<2x32xf32>
    %71 = arith.mulf %66, %70 : vector<2x32xf32>
    %72 = vector.extract_strided_slice %7 {offsets = [6, 0], sizes = [2, 128], strides = [1, 1]} : vector<16x128xf32> to vector<2x128xf32>
    %cst_17 = arith.constant dense<0.000000e+00> : vector<2x128xf32>
    %73 = tpu.matmul %71, %24, %cst_17 {dimension_numbers = #tpu.dot_dimension_numbers<[1], [0], [0], [1], [0, 0, 1, 1], [], []>} : vector<2x32xf32>, vector<32x128xf32>, vector<2x128xf32> -> vector<2x128xf32>
    %74 = arith.addf %72, %73 : vector<2x128xf32>
    %75 = math.tanh %74 : vector<2x128xf32>
    %76 = arith.mulf %18, %75 : vector<2x128xf32>
    %77 = arith.addf %76, %23 : vector<2x128xf32>
    %78 = vector.extract_strided_slice %77 {offsets = [0, 0], sizes = [2, 32], strides = [1, 1]} : vector<2x128xf32> to vector<2x32xf32>
    %79 = vector.extract_strided_slice %77 {offsets = [0, 32], sizes = [2, 32], strides = [1, 1]} : vector<2x128xf32> to vector<2x32xf32>
    %80 = vector.extract_strided_slice %77 {offsets = [0, 64], sizes = [2, 32], strides = [1, 1]} : vector<2x128xf32> to vector<2x32xf32>
    %81 = vector.extract_strided_slice %77 {offsets = [0, 96], sizes = [2, 32], strides = [1, 1]} : vector<2x128xf32> to vector<2x32xf32>
    %82 = arith.mulf %79, %69 : vector<2x32xf32>
    %83 = arith.mulf %78, %80 : vector<2x32xf32>
    %84 = arith.addf %82, %83 : vector<2x32xf32>
    %85 = math.tanh %84 : vector<2x32xf32>
    %86 = arith.mulf %81, %85 : vector<2x32xf32>
    %87 = vector.extract_strided_slice %7 {offsets = [8, 0], sizes = [2, 128], strides = [1, 1]} : vector<16x128xf32> to vector<2x128xf32>
    %cst_18 = arith.constant dense<0.000000e+00> : vector<2x128xf32>
    %88 = tpu.matmul %86, %24, %cst_18 {dimension_numbers = #tpu.dot_dimension_numbers<[1], [0], [0], [1], [0, 0, 1, 1], [], []>} : vector<2x32xf32>, vector<32x128xf32>, vector<2x128xf32> -> vector<2x128xf32>
    %89 = arith.addf %87, %88 : vector<2x128xf32>
    %90 = math.tanh %89 : vector<2x128xf32>
    %91 = arith.mulf %18, %90 : vector<2x128xf32>
    %92 = arith.addf %91, %23 : vector<2x128xf32>
    %93 = vector.extract_strided_slice %92 {offsets = [0, 0], sizes = [2, 32], strides = [1, 1]} : vector<2x128xf32> to vector<2x32xf32>
    %94 = vector.extract_strided_slice %92 {offsets = [0, 32], sizes = [2, 32], strides = [1, 1]} : vector<2x128xf32> to vector<2x32xf32>
    %95 = vector.extract_strided_slice %92 {offsets = [0, 64], sizes = [2, 32], strides = [1, 1]} : vector<2x128xf32> to vector<2x32xf32>
    %96 = vector.extract_strided_slice %92 {offsets = [0, 96], sizes = [2, 32], strides = [1, 1]} : vector<2x128xf32> to vector<2x32xf32>
    %97 = arith.mulf %94, %84 : vector<2x32xf32>
    %98 = arith.mulf %93, %95 : vector<2x32xf32>
    %99 = arith.addf %97, %98 : vector<2x32xf32>
    %100 = math.tanh %99 : vector<2x32xf32>
    %101 = arith.mulf %96, %100 : vector<2x32xf32>
    %102 = vector.extract_strided_slice %7 {offsets = [10, 0], sizes = [2, 128], strides = [1, 1]} : vector<16x128xf32> to vector<2x128xf32>
    %cst_19 = arith.constant dense<0.000000e+00> : vector<2x128xf32>
    %103 = tpu.matmul %101, %24, %cst_19 {dimension_numbers = #tpu.dot_dimension_numbers<[1], [0], [0], [1], [0, 0, 1, 1], [], []>} : vector<2x32xf32>, vector<32x128xf32>, vector<2x128xf32> -> vector<2x128xf32>
    %104 = arith.addf %102, %103 : vector<2x128xf32>
    %105 = math.tanh %104 : vector<2x128xf32>
    %106 = arith.mulf %18, %105 : vector<2x128xf32>
    %107 = arith.addf %106, %23 : vector<2x128xf32>
    %108 = vector.extract_strided_slice %107 {offsets = [0, 0], sizes = [2, 32], strides = [1, 1]} : vector<2x128xf32> to vector<2x32xf32>
    %109 = vector.extract_strided_slice %107 {offsets = [0, 32], sizes = [2, 32], strides = [1, 1]} : vector<2x128xf32> to vector<2x32xf32>
    %110 = vector.extract_strided_slice %107 {offsets = [0, 64], sizes = [2, 32], strides = [1, 1]} : vector<2x128xf32> to vector<2x32xf32>
    %111 = vector.extract_strided_slice %107 {offsets = [0, 96], sizes = [2, 32], strides = [1, 1]} : vector<2x128xf32> to vector<2x32xf32>
    %112 = arith.mulf %109, %99 : vector<2x32xf32>
    %113 = arith.mulf %108, %110 : vector<2x32xf32>
    %114 = arith.addf %112, %113 : vector<2x32xf32>
    %115 = math.tanh %114 : vector<2x32xf32>
    %116 = arith.mulf %111, %115 : vector<2x32xf32>
    %117 = vector.extract_strided_slice %7 {offsets = [12, 0], sizes = [2, 128], strides = [1, 1]} : vector<16x128xf32> to vector<2x128xf32>
    %cst_20 = arith.constant dense<0.000000e+00> : vector<2x128xf32>
    %118 = tpu.matmul %116, %24, %cst_20 {dimension_numbers = #tpu.dot_dimension_numbers<[1], [0], [0], [1], [0, 0, 1, 1], [], []>} : vector<2x32xf32>, vector<32x128xf32>, vector<2x128xf32> -> vector<2x128xf32>
    %119 = arith.addf %117, %118 : vector<2x128xf32>
    %120 = math.tanh %119 : vector<2x128xf32>
    %121 = arith.mulf %18, %120 : vector<2x128xf32>
    %122 = arith.addf %121, %23 : vector<2x128xf32>
    %123 = vector.extract_strided_slice %122 {offsets = [0, 0], sizes = [2, 32], strides = [1, 1]} : vector<2x128xf32> to vector<2x32xf32>
    %124 = vector.extract_strided_slice %122 {offsets = [0, 32], sizes = [2, 32], strides = [1, 1]} : vector<2x128xf32> to vector<2x32xf32>
    %125 = vector.extract_strided_slice %122 {offsets = [0, 64], sizes = [2, 32], strides = [1, 1]} : vector<2x128xf32> to vector<2x32xf32>
    %126 = vector.extract_strided_slice %122 {offsets = [0, 96], sizes = [2, 32], strides = [1, 1]} : vector<2x128xf32> to vector<2x32xf32>
    %127 = arith.mulf %124, %114 : vector<2x32xf32>
    %128 = arith.mulf %123, %125 : vector<2x32xf32>
    %129 = arith.addf %127, %128 : vector<2x32xf32>
    %130 = math.tanh %129 : vector<2x32xf32>
    %131 = arith.mulf %126, %130 : vector<2x32xf32>
    %132 = vector.extract_strided_slice %7 {offsets = [14, 0], sizes = [2, 128], strides = [1, 1]} : vector<16x128xf32> to vector<2x128xf32>
    %cst_21 = arith.constant dense<0.000000e+00> : vector<2x128xf32>
    %133 = tpu.matmul %131, %24, %cst_21 {dimension_numbers = #tpu.dot_dimension_numbers<[1], [0], [0], [1], [0, 0, 1, 1], [], []>} : vector<2x32xf32>, vector<32x128xf32>, vector<2x128xf32> -> vector<2x128xf32>
    %134 = arith.addf %132, %133 : vector<2x128xf32>
    %135 = math.tanh %134 : vector<2x128xf32>
    %136 = arith.mulf %18, %135 : vector<2x128xf32>
    %137 = arith.addf %136, %23 : vector<2x128xf32>
    %138 = vector.extract_strided_slice %137 {offsets = [0, 0], sizes = [2, 32], strides = [1, 1]} : vector<2x128xf32> to vector<2x32xf32>
    %139 = vector.extract_strided_slice %137 {offsets = [0, 32], sizes = [2, 32], strides = [1, 1]} : vector<2x128xf32> to vector<2x32xf32>
    %140 = vector.extract_strided_slice %137 {offsets = [0, 64], sizes = [2, 32], strides = [1, 1]} : vector<2x128xf32> to vector<2x32xf32>
    %141 = vector.extract_strided_slice %137 {offsets = [0, 96], sizes = [2, 32], strides = [1, 1]} : vector<2x128xf32> to vector<2x32xf32>
    %142 = arith.mulf %139, %129 : vector<2x32xf32>
    %143 = arith.mulf %138, %140 : vector<2x32xf32>
    %144 = arith.addf %142, %143 : vector<2x32xf32>
    %145 = math.tanh %144 : vector<2x32xf32>
    %146 = arith.mulf %141, %145 : vector<2x32xf32>
    %147 = tpu.concatenate %41, %56, %71, %86, %101, %116, %131, %146 in 0 : vector<2x32xf32>, vector<2x32xf32>, vector<2x32xf32>, vector<2x32xf32>, vector<2x32xf32>, vector<2x32xf32>, vector<2x32xf32>, vector<2x32xf32> -> vector<16x32xf32>
    %148 = arith.truncf %147 : vector<16x32xf32> to vector<16x32xbf16>
    %c0_22 = arith.constant 0 : index
    %c0_23 = arith.constant 0 : index
    %149 = vector.load %arg4[%c0_22, %c0_23] : memref<32x4xbf16, #tpu.memory_space<vmem>>, vector<32x4xbf16>
    %cst_24 = arith.constant dense<0.000000e+00> : vector<16x4xf32>
    %150 = tpu.matmul %148, %149, %cst_24 {dimension_numbers = #tpu.dot_dimension_numbers<[1], [0], [0], [1], [0, 0, 1, 1], [], []>} : vector<16x32xbf16>, vector<32x4xbf16>, vector<16x4xf32> -> vector<16x4xf32>
    %c0_25 = arith.constant 0 : index
    %c0_26 = arith.constant 0 : index
    %151 = vector.load %arg5[%c0_25, %c0_26] : memref<1x4xf32, #tpu.memory_space<vmem>>, vector<1x4xf32>
    %152 = vector.broadcast %151 : vector<1x4xf32> to vector<16x4xf32>
    %153 = arith.addf %150, %152 : vector<16x4xf32>
    %154 = vector.shape_cast %153 : vector<16x4xf32> to vector<8x2x4xf32>
    %c0_27 = arith.constant 0 : index
    %c0_28 = arith.constant 0 : index
    %c0_29 = arith.constant 0 : index
    %155 = vector.load %arg6[%c0_27, %c0_28, %c0_29] : memref<8x2x4xf32, #tpu.memory_space<vmem>>, vector<8x2x4xf32>
    tpu.vector_store %arg6[%c0_27, %c0_28, %c0_29], %154 {strides = array<i32>} : memref<8x2x4xf32, #tpu.memory_space<vmem>>, vector<8x2x4xf32>,
    return
  }
}

</mosaic_0001>

<bundles_post_ra>
// kernel: generator_forward.1
= control target key start
LH: loop header
LB: loop body
LE: loop exit
PB: predicated region body
PF: predicated region fallthrough
CT: control target
= control target key end

     0   :  { %vm89_vm0 = vcmask 1041408   ;;  %v1292_v0 = vmov 0.0   ;;  %v1293_v4 = vmov 1983009808   ;;  %v45_v6 = vlaneseq  ;;  %s1297_s22 = smov 32   ;;  %s1610_s2 = inlined_call_operand.vmem [shape: f32[32,128], index: 2, kind: input, shape index: {}]   ;;  %s1611_s1 = inlined_call_operand.vmem [shape: bf16[4,128], index: 1, kind: input, shape index: {}]   ;;  %s1612_s0 = inlined_call_operand.vmem [shape: f32[8,2,4], index: 0, kind: input, shape index: {}]   ;;  %s1613_s3 = inlined_call_operand.vmem [shape: f32[1,128], index: 3, kind: input, shape index: {}]   ;;  %s1614_s4 = inlined_call_operand.vmem [shape: bf16[32,4], index: 4, kind: input, shape index: {}]   ;;  %s1615_s5 = inlined_call_operand.vmem [shape: f32[1,4], index: 5, kind: input, shape index: {}]   ;;  %s1616_s6 = inlined_call_operand.vmem [shape: f32[8,2,4], index: 6, kind: output, shape index: {}]  }
   0x1   :  { %1156 = vmatprep.subr.mxu1 %v1292_v0  ;;  %v1337_v1 = vld [vmem:[%s1610_s2 + $0x18] sm:$0xff]  ;;  %v1342_v2 = vld [vmem:[%s1610_s2 + $0x10] sm:$0xff]  ;;  %1150 = vmatprep.subr.bf16.mxu0 %v1292_v0  ;;  %v77_v3 = vld [vmem:[%s1611_s1] sm:$0x3]  ;;  %v43_v5 = vunpack.c.l.s4 %v1293_v4  ;;  %vm1294_vm1 = vmmov 0   ;;  %vm85_vm2 = vcmask 31744  }
   0x2   :  { %1157 = vmatpush3.msra.mxu1 %v1337_v1  ;;  %v91_v7 = vsel %vm89_vm0, %v77_v3, 0  ;;  %v1353_v8 = vld [vmem:[%s1610_s2 + $0x8] sm:$0xff]  ;;  %1152 = vmatprep.mubr.msk.bf16.mxu0 %vm1294_vm1, %v1292_v0  ;;  %v24_v9 = vld [vmem:[%s1612_s0] sm:$0x3]  ;;  %v25_v10 = vld [vmem:[%s1612_s0 + $0x2] sm:$0x3] }
   0x3   :  { %1158 = vmatprep.subr.mxu1 %v1292_v0  ;;  %1151 = vmatpush3.bf16.msra.mxu0 %v91_v7  ;;  %v26_v11 = vld [vmem:[%s1612_s0 + $0x4] sm:$0x3]  ;;  %v27_v12 = vld [vmem:[%s1612_s0 + $0x6] sm:$0x3]  ;;  %v44_v13 = vunpack.c.0.s8 %v43_v5  ;;  %v28_v14 = vld [vmem:[%s1612_s0 + $0x8] sm:$0x3]  ;;  %v40_v19 = vcombine.low %v24_v9, %v25_v10 }
   0x4   :  { %1159 = vmatpush3.msra.mxu1 %v1342_v2  ;;  %1164 = vmatprep.mubr.msk.f32.mxu1 %vm1294_vm1, %v1292_v0  ;;  %v29_v15 = vld [vmem:[%s1612_s0 + $0xa] sm:$0x3]  ;;  %v30_v16 = vld [vmem:[%s1612_s0 + $0xc] sm:$0x3]  ;;  %v1386_v17 = vld [vmem:[%s1610_s2] sm:$0xff]  ;;  %v41_v20 = vcombine.low %v26_v11, %v27_v12  ;;  %v46_v21 = vshrl.u32 %v45_v6, 7 }
   0x5   :  { %1160 = vmatprep.subr.mxu1 %v1292_v0  ;;  %v31_v18 = vld [vmem:[%s1612_s0 + $0xe] sm:$0x3]  ;;  %v57_v22 = vcombine.low %v28_v14, %v29_v15  ;;  %1167 = vmatprep.subr.mxu0 %v1292_v0  ;;  %v1092_v34 = vld [vmem:[%s1613_s3] ss:$0 sm:$0xff]  ;;  %v135_v42 = vand.u32 127, %v45_v6  ;;  %v1295_v43 = vmov 0.5  }
   0x6   :  { %1161 = vmatpush3.msra.mxu1 %v1353_v8  ;;  %v58_v23 = vcombine.low %v30_v16, %v31_v18  ;;  %v1395_v24 = vsub.s32 %v44_v13, %v46_v21  ;;  %s1296_s3 = smov 64   ;;  %vm145_vm6 = vcmask 261120   ;;  %vm957_vm7 = vcmask 1043456  }
   0x7   :  { %1162 = vmatprep.subr.mxu1 %v1292_v0  ;;  %vm136_vm3 = vcmp.ge.s32.totalorder %v135_v42, 64  ;;  %vm137_vm4 = vcmp.lt.s32.totalorder %v135_v42, 96  ;;  %vm959_vm8 = vcmask 1045504   ;;  %vm1079_vm9 = vcmask 25600  }
   0x8   :  { %1163 = vmatpush3.msra.mxu1 %v1386_v17  ;;  %v48_v25 = vrot.slane %v40_v19, %v1395_v24  ;;  %v55_v26 = vrot.slane %v41_v20, %v1395_v24  ;;  %v65_v27 = vrot.slane %v57_v22, %v1395_v24  ;;  %v72_v28 = vrot.slane %v58_v23, %v1395_v24  ;;  %vm138_vm5 = vmand %vm136_vm3, %vm137_vm4 }
   0x9   :  { %1165 = vmatmul.mubr.f32.vlgmr.msra.gmra.mxu1 %v1292_v0  ;;  %1178 = vmatprep.subr.mxu1 %v1292_v0  ;;  %v1433_v44 = vsel %vm138_vm5, 1.0, %v1295_v43  ;;  %v1435_v46 = vsel %vm138_vm5, 0.0, %v1295_v43 }
   0xa   :  { %1186 = vmatprep.mubr.msk.f32.mxu1 %vm1294_vm1, %v1292_v0  ;;  %v56_v29 = vcombine.low %v48_v25, %v55_v26  ;;  %v73_v30 = vcombine.low %v65_v27, %v72_v28  ;;  %1179 = vmatpush3.msra.mxu1 %v1337_v1 }
   0xb   :  { %1180 = vmatprep.subr.mxu1 %v1292_v0 }
   0xc   :  { %v76_v31 = vpack.c.bf16 %v73_v30, %v56_v29  ;;  %1181 = vmatpush3.msra.mxu1 %v1342_v2 }
   0xd   :  { %1182 = vmatprep.subr.mxu1 %v1292_v0 }
   0xe   :  { %1153 = vmatmul.mubr.msk.bf16.vlgmr.msra.gmra.mxu0 %vm85_vm2, %v76_v31  ;;  %1183 = vmatpush3.msra.mxu1 %v1353_v8 }
   0xf   :  { %1168 = vmatpush3.msra.mxu0 %v1337_v1  ;;  %1175 = vmatprep.mubr.msk.f32.mxu0 %vm1294_vm1, %v1292_v0 }
  0x10   :  { %1169 = vmatprep.subr.mxu0 %v1292_v0  ;;  %1184 = vmatprep.subr.mxu1 %v1292_v0 }
  0x11   :  { %1170 = vmatpush3.msra.mxu0 %v1342_v2  ;;  %1185 = vmatpush3.msra.mxu1 %v1386_v17 }
  0x12   :  { %1171 = vmatprep.subr.mxu0 %v1292_v0  ;;  %1200 = vmatprep.subr.mxu1 %v1292_v0 }
  0x13   :  { %1172 = vmatpush3.msra.mxu0 %v1353_v8 }
  0x14   :  { %1173 = vmatprep.subr.mxu0 %v1292_v0 }
  0x15   :  { %1174 = vmatpush3.msra.mxu0 %v1386_v17 }
  0x16   :  { %1189 = vmatprep.subr.mxu0 %v1292_v0 }
  0xc9   :  { %v215_v32 = vpop.f32.mrf.mxu1 }
  0xcb   :  { %v1166_v33 = vpop.f32.mrf.mxu1 }
  0xce   :  { %v127_v35 = vpop.f32.mrf.mxu0 }
  0xcf   :  { %v1427_v36 = vadd.f32 %v1092_v34, %v127_v35 }
  0xd0   :  { %v1154_v37 = vpop.f32.mrf.mxu0 }
  0xd1   :  { %v219_v38 = vadd.f32 %v215_v32, %v1427_v36 }
  0xd2   :  { %v130_v39 = vpop.f32.mrf.mxu0 }
  0xd3   :  { %1260 = vtanh.f32 %v219_v38  ;;  %v1430_v40 = vadd.f32 %v1092_v34, %v130_v39 }
  0xd4   :  { %v1155_v41 = vpop.f32.mrf.mxu0 }
  0xe0   :  { %v1261_v45 = vpop.eup %1260 }
  0xe1   :  { %v221_v47 = vmul.f32 %v1261_v45, %v1433_v44 }
  0xe3   :  { %v222_v48 = vadd.f32 %v221_v47, %v1435_v46 }
  0xe5   :  { %225 = vrot.lane.b32.xlu0 %v222_v48, %s1296_s3  ;;  %v223_v51 = vmul.f32 0.0, %v222_v48 }
 0x157   :  { %v226_v49 = vpop.permute.xlu0 %225 }
 0x158   :  { %v228_v50 = vmul.f32 %v226_v49, %v222_v48 }
 0x15a   :  { %230 = vrot.lane.b32.xlu0 %v228_v50, %s1297_s22 }
 0x1cc   :  { %v231_v52 = vpop.permute.xlu0 %230 }
 0x1cd   :  { %v233_v53 = vadd.f32 %v231_v52, %v223_v51 }
 0x1cf   :  { %1262 = vtanh.f32 %v233_v53  ;;  %v323_v6 = vrot.slane %v233_v53, 6 }
 0x1dc   :  { %v1263_v54 = vpop.eup %1262 }
 0x1dd   :  { %236 = vrot.lane.b32.xlu1 %v1263_v54, %s1296_s3 }
 0x24f   :  { %v237_v55 = vpop.permute.xlu1 %236 }
 0x250   :  { %v1442_v56 = vmul.f32 %v237_v55, %v222_v48 }
 0x252   :  { %241 = vrot.lane.b32.xlu1 %v1442_v56, %s1297_s22 }
 0x2c4   :  { %v242_v57 = vpop.permute.xlu1 %241 }
 0x2c5   :  { %1176 = vmatmul.mubr.msk.f32.vlgmr.msra.gmra.mxu0 %vm145_vm6, %v242_v57 }
 0x2c6   :  { %1190 = vmatpush3.msra.mxu0 %v1337_v1  ;;  %1197 = vmatprep.mubr.msk.f32.mxu0 %vm1294_vm1, %v1292_v0 }
 0x2c7   :  { %1191 = vmatprep.subr.mxu0 %v1292_v0 }
 0x2c8   :  { %1192 = vmatpush3.msra.mxu0 %v1342_v2 }
 0x2c9   :  { %1193 = vmatprep.subr.mxu0 %v1292_v0 }
 0x2ca   :  { %1194 = vmatpush3.msra.mxu0 %v1353_v8 }
 0x2cb   :  { %1195 = vmatprep.subr.mxu0 %v1292_v0 }
 0x2cc   :  { %1196 = vmatpush3.msra.mxu0 %v1386_v17 }
 0x2cd   :  { %1211 = vmatprep.subr.mxu0 %v1292_v0 }
 0x385   :  { %v311_v58 = vpop.f32.mrf.mxu0 }
 0x386   :  { %v316_v59 = vrot.slane %v311_v58, 6 }
 0x387   :  { %v1177_v60 = vpop.f32.mrf.mxu0 }
 0x388   :  { %v318_v61 = vadd.f32 %v316_v59, %v1427_v36 }
 0x38a   :  { %1264 = vtanh.f32 %v318_v61 }
 0x397   :  { %v1265_v62 = vpop.eup %1264 }
 0x398   :  { %v320_v63 = vmul.f32 %v1265_v62, %v1433_v44 }
 0x39a   :  { %v321_v3 = vadd.f32 %v320_v63, %v1435_v46 }
 0x39c   :  { %327 = vrot.lane.b32.xlu0 %v321_v3, %s1296_s3  ;;  %v325_v7 = vmul.f32 %v323_v6, %v321_v3 }
 0x40e   :  { %v328_v4 = vpop.permute.xlu0 %327 }
 0x40f   :  { %v330_v5 = vmul.f32 %v328_v4, %v321_v3 }
 0x411   :  { %332 = vrot.lane.b32.xlu1 %v330_v5, %s1297_s22 }
 0x483   :  { %v333_v9 = vpop.permute.xlu1 %332 }
 0x484   :  { %v335_v10 = vadd.f32 %v333_v9, %v325_v7 }
 0x486   :  { %1266 = vtanh.f32 %v335_v10  ;;  %v426_v27 = vrot.slane %v335_v10, 6 }
 0x493   :  { %v1267_v11 = vpop.eup %1266 }
 0x494   :  { %338 = vrot.lane.b32.xlu0 %v1267_v11, %s1296_s3 }
 0x506   :  { %v339_v12 = vpop.permute.xlu0 %338 }
 0x507   :  { %v341_v13 = vmul.f32 %v339_v12, %v321_v3 }
 0x509   :  { %v343_v14 = vrot.slane %v341_v13, 2  ;;  %v956_v34 = vsel %vm89_vm0, %v1442_v56, %v341_v13 }
 0x50b   :  { %344 = vrot.lane.b32.xlu1 %v343_v14, %s1297_s22 }
 0x57d   :  { %v345_v15 = vpop.permute.xlu1 %344 }
 0x57e   :  { %1187 = vmatmul.mubr.msk.f32.vlgmr.msra.gmra.mxu1 %vm145_vm6, %v345_v15 }
 0x57f   :  { %1201 = vmatpush3.msra.mxu1 %v1337_v1  ;;  %1208 = vmatprep.mubr.msk.f32.mxu1 %vm1294_vm1, %v1292_v0 }
 0x580   :  { %1202 = vmatprep.subr.mxu1 %v1292_v0 }
 0x581   :  { %1203 = vmatpush3.msra.mxu1 %v1342_v2 }
 0x582   :  { %1204 = vmatprep.subr.mxu1 %v1292_v0 }
 0x583   :  { %1205 = vmatpush3.msra.mxu1 %v1353_v8 }
 0x584   :  { %1206 = vmatprep.subr.mxu1 %v1292_v0 }
 0x585   :  { %1207 = vmatpush3.msra.mxu1 %v1386_v17 }
 0x586   :  { %1222 = vmatprep.subr.mxu1 %v1292_v0 }
 0x63e   :  { %v414_v16 = vpop.f32.mrf.mxu1 }
 0x63f   :  { %v419_v18 = vrot.slane %v414_v16, 4 }
 0x640   :  { %v1188_v19 = vpop.f32.mrf.mxu1 }
 0x641   :  { %v421_v20 = vadd.f32 %v419_v18, %v1427_v36 }
 0x643   :  { %1268 = vtanh.f32 %v421_v20 }
 0x650   :  { %v1269_v21 = vpop.eup %1268 }
 0x651   :  { %v423_v22 = vmul.f32 %v1269_v21, %v1433_v44 }
 0x653   :  { %v424_v23 = vadd.f32 %v423_v22, %v1435_v46 }
 0x655   :  { %430 = vrot.lane.b32.xlu0 %v424_v23, %s1296_s3  ;;  %v428_v28 = vmul.f32 %v426_v27, %v424_v23 }
 0x6c7   :  { %v431_v25 = vpop.permute.xlu0 %430 }
 0x6c8   :  { %v433_v26 = vmul.f32 %v431_v25, %v424_v23 }
 0x6ca   :  { %435 = vrot.lane.b32.xlu1 %v433_v26, %s1297_s22 }
 0x73c   :  { %v436_v29 = vpop.permute.xlu1 %435 }
 0x73d   :  { %v438_v30 = vadd.f32 %v436_v29, %v428_v28 }
 0x73f   :  { %1270 = vtanh.f32 %v438_v30  ;;  %v529_v51 = vrot.slane %v438_v30, 6 }
 0x74c   :  { %v1271_v31 = vpop.eup %1270 }
 0x74d   :  { %441 = vrot.lane.b32.xlu0 %v1271_v31, %s1296_s3 }
 0x7bf   :  { %v442_v32 = vpop.permute.xlu0 %441 }
 0x7c0   :  { %v444_v33 = vmul.f32 %v442_v32, %v424_v23 }
 0x7c2   :  { %v446_v35 = vrot.slane %v444_v33, 4  ;;  %v958_v37 = vsel %vm957_vm7, %v956_v34, %v444_v33 }
 0x7c4   :  { %447 = vrot.lane.b32.xlu1 %v446_v35, %s1297_s22 }
 0x836   :  { %v448_v38 = vpop.permute.xlu1 %447 }
 0x837   :  { %1198 = vmatmul.mubr.msk.f32.vlgmr.msra.gmra.mxu0 %vm145_vm6, %v448_v38 }
 0x838   :  { %1212 = vmatpush3.msra.mxu0 %v1337_v1  ;;  %1219 = vmatprep.mubr.msk.f32.mxu0 %vm1294_vm1, %v1292_v0 }
 0x839   :  { %1213 = vmatprep.subr.mxu0 %v1292_v0 }
 0x83a   :  { %1214 = vmatpush3.msra.mxu0 %v1342_v2 }
 0x83b   :  { %1215 = vmatprep.subr.mxu0 %v1292_v0 }
 0x83c   :  { %1216 = vmatpush3.msra.mxu0 %v1353_v8 }
 0x83d   :  { %1217 = vmatprep.subr.mxu0 %v1292_v0 }
 0x83e   :  { %1218 = vmatpush3.msra.mxu0 %v1386_v17 }
 0x83f   :  { %1233 = vmatprep.subr.mxu0 %v1292_v0 }
 0x8f7   :  { %v517_v39 = vpop.f32.mrf.mxu0 }
 0x8f8   :  { %v522_v41 = vrot.slane %v517_v39, 2 }
 0x8f9   :  { %v1199_v42 = vpop.f32.mrf.mxu0 }
 0x8fa   :  { %v524_v43 = vadd.f32 %v522_v41, %v1427_v36 }
 0x8fc   :  { %1272 = vtanh.f32 %v524_v43 }
 0x909   :  { %v1273_v45 = vpop.eup %1272 }
 0x90a   :  { %v526_v47 = vmul.f32 %v1273_v45, %v1433_v44 }
 0x90c   :  { %v527_v48 = vadd.f32 %v526_v47, %v1435_v46 }
 0x90e   :  { %533 = vrot.lane.b32.xlu0 %v527_v48, %s1296_s3  ;;  %v531_v52 = vmul.f32 %v529_v51, %v527_v48 }
 0x980   :  { %v534_v49 = vpop.permute.xlu0 %533 }
 0x981   :  { %v536_v50 = vmul.f32 %v534_v49, %v527_v48 }
 0x983   :  { %538 = vrot.lane.b32.xlu1 %v536_v50, %s1297_s22 }
 0x9f5   :  { %v539_v53 = vpop.permute.xlu1 %538 }
 0x9f6   :  { %v541_v54 = vadd.f32 %v539_v53, %v531_v52 }
 0x9f8   :  { %1274 = vtanh.f32 %v541_v54  ;;  %v629_v7 = vrot.slane %v541_v54, 6 }
 0xa05   :  { %v1275_v55 = vpop.eup %1274 }
 0xa06   :  { %544 = vrot.lane.b32.xlu0 %v1275_v55, %s1296_s3 }
 0xa78   :  { %v545_v36 = vpop.permute.xlu0 %544 }
 0xa79   :  { %v547_v56 = vmul.f32 %v545_v36, %v527_v48 }
 0xa7b   :  { %v549_v57 = vrot.slane %v547_v56, 6  ;;  %v1503_v58 = vsel %vm959_vm8, %v958_v37, %v547_v56 }
 0xa7d   :  { %550 = vrot.lane.b32.xlu1 %v549_v57, %s1297_s22 }
 0xaef   :  { %v551_v59 = vpop.permute.xlu1 %550 }
 0xaf0   :  { %1209 = vmatmul.mubr.msk.f32.vlgmr.msra.gmra.mxu1 %vm145_vm6, %v551_v59 }
 0xaf1   :  { %1223 = vmatpush3.msra.mxu1 %v1337_v1  ;;  %1230 = vmatprep.mubr.msk.f32.mxu1 %vm1294_vm1, %v1292_v0 }
 0xaf2   :  { %1224 = vmatprep.subr.mxu1 %v1292_v0 }
 0xaf3   :  { %1225 = vmatpush3.msra.mxu1 %v1342_v2 }
 0xaf4   :  { %1226 = vmatprep.subr.mxu1 %v1292_v0 }
 0xaf5   :  { %1227 = vmatpush3.msra.mxu1 %v1353_v8 }
 0xaf6   :  { %1228 = vmatprep.subr.mxu1 %v1292_v0 }
 0xaf7   :  { %1229 = vmatpush3.msra.mxu1 %v1386_v17 }
 0xaf8   :  { %1244 = vmatprep.subr.bf16.mxu1 %v1292_v0 }
 0xbb0   :  { %v620_v60 = vpop.f32.mrf.mxu1 }
 0xbb1   :  { %v624_v61 = vadd.f32 %v620_v60, %v1430_v40 }
 0xbb2   :  { %v1210_v62 = vpop.f32.mrf.mxu1 }
 0xbb3   :  { %1276 = vtanh.f32 %v624_v61 }
 0xbc0   :  { %v1277_v63 = vpop.eup %1276 }
 0xbc1   :  { %v626_v3 = vmul.f32 %v1277_v63, %v1433_v44 }
 0xbc3   :  { %v627_v4 = vadd.f32 %v626_v3, %v1435_v46 }
 0xbc5   :  { %633 = vrot.lane.b32.xlu0 %v627_v4, %s1296_s3  ;;  %v631_v9 = vmul.f32 %v629_v7, %v627_v4 }
 0xc37   :  { %v634_v5 = vpop.permute.xlu0 %633 }
 0xc38   :  { %v636_v6 = vmul.f32 %v634_v5, %v627_v4 }
 0xc3a   :  { %638 = vrot.lane.b32.xlu1 %v636_v6, %s1297_s22 }
 0xcac   :  { %v639_v10 = vpop.permute.xlu1 %638 }
 0xcad   :  { %v641_v11 = vadd.f32 %v639_v10, %v631_v9 }
 0xcaf   :  { %1278 = vtanh.f32 %v641_v11 }
 0xcbc   :  { %v1279_v12 = vpop.eup %1278 }
 0xcbd   :  { %644 = vrot.lane.b32.xlu0 %v1279_v12, %s1296_s3 }
 0xd2f   :  { %v645_v13 = vpop.permute.xlu0 %644 }
 0xd30   :  { %v647_v14 = vmul.f32 %v645_v13, %v627_v4 }
 0xd32   :  { %649 = vrot.lane.b32.xlu1 %v647_v14, %s1297_s22 }
 0xda4   :  { %v650_v15 = vpop.permute.xlu1 %649 }
 0xda5   :  { %1220 = vmatmul.mubr.msk.f32.vlgmr.msra.gmra.mxu0 %vm145_vm6, %v650_v15 }
 0xda6   :  { %1234 = vmatpush3.msra.mxu0 %v1337_v1  ;;  %1241 = vmatprep.mubr.msk.f32.mxu0 %vm1294_vm1, %v1292_v0 }
 0xda7   :  { %1235 = vmatprep.subr.mxu0 %v1292_v0 }
 0xda8   :  { %1236 = vmatpush3.msra.mxu0 %v1342_v2 }
 0xda9   :  { %1237 = vmatprep.subr.mxu0 %v1292_v0 }
 0xdaa   :  { %1238 = vmatpush3.msra.mxu0 %v1353_v8  ;;  %v731_v8 = vrot.slane %v641_v11, 6 }
 0xdab   :  { %1239 = vmatprep.subr.mxu0 %v1292_v0 }
 0xdac   :  { %1240 = vmatpush3.msra.mxu0 %v1386_v17 }
 0xe65   :  { %v719_v16 = vpop.f32.mrf.mxu0 }
 0xe66   :  { %v724_v18 = vrot.slane %v719_v16, 6 }
 0xe67   :  { %v1221_v19 = vpop.f32.mrf.mxu0 }
 0xe68   :  { %v726_v1 = vadd.f32 %v724_v18, %v1430_v40 }
 0xe6a   :  { %1280 = vtanh.f32 %v726_v1 }
 0xe77   :  { %v1281_v20 = vpop.eup %1280 }
 0xe78   :  { %v728_v21 = vmul.f32 %v1281_v20, %v1433_v44 }
 0xe7a   :  { %v729_v22 = vadd.f32 %v728_v21, %v1435_v46 }
 0xe7c   :  { %735 = vrot.lane.b32.xlu0 %v729_v22, %s1296_s3  ;;  %v733_v25 = vmul.f32 %v731_v8, %v729_v22 }
 0xeee   :  { %v736_v2 = vpop.permute.xlu0 %735 }
 0xeef   :  { %v738_v23 = vmul.f32 %v736_v2, %v729_v22 }
 0xef1   :  { %740 = vrot.lane.b32.xlu1 %v738_v23, %s1297_s22 }
 0xf63   :  { %v741_v17 = vpop.permute.xlu1 %740 }
 0xf64   :  { %v743_v26 = vadd.f32 %v741_v17, %v733_v25 }
 0xf66   :  { %1282 = vtanh.f32 %v743_v26  ;;  %v834_v43 = vrot.slane %v743_v26, 6 }
 0xf73   :  { %v1283_v27 = vpop.eup %1282 }
 0xf74   :  { %746 = vrot.lane.b32.xlu0 %v1283_v27, %s1296_s3 }
 0xfe6   :  { %v747_v28 = vpop.permute.xlu0 %746 }
 0xfe7   :  { %v749_v29 = vmul.f32 %v747_v28, %v729_v22 }
 0xfe9   :  { %v751_v30 = vrot.slane %v749_v29, 2  ;;  %v961_v52 = vsel %vm89_vm0, %v647_v14, %v749_v29  ;;  %v1101_v14 = vld [vmem:[%s1615_s5] ss:$0 sm:$0xff] }
 0xfeb   :  { %752 = vrot.lane.b32.xlu1 %v751_v30, %s1297_s22 }
0x105d   :  { %v753_v31 = vpop.permute.xlu1 %752 }
0x105e   :  { %1231 = vmatmul.mubr.msk.f32.vlgmr.msra.gmra.mxu1 %vm145_vm6, %v753_v31 }
0x105f   :  { %1248 = vmatprep.mubr.msk.bf16.mxu1 %vm1294_vm1, %v1292_v0 }
0x111e   :  { %v822_v32 = vpop.f32.mrf.mxu1 }
0x111f   :  { %v827_v33 = vrot.slane %v822_v32, 4 }
0x1120   :  { %v1232_v34 = vpop.f32.mrf.mxu1 }
0x1121   :  { %v829_v35 = vadd.f32 %v827_v33, %v1430_v40 }
0x1123   :  { %1284 = vtanh.f32 %v829_v35 }
0x1130   :  { %v1285_v37 = vpop.eup %1284 }
0x1131   :  { %v831_v38 = vmul.f32 %v1285_v37, %v1433_v44 }
0x1133   :  { %v832_v39 = vadd.f32 %v831_v38, %v1435_v46 }
0x1135   :  { %838 = vrot.lane.b32.xlu0 %v832_v39, %s1296_s3  ;;  %v836_v45 = vmul.f32 %v834_v43, %v832_v39 }
0x11a7   :  { %v839_v41 = vpop.permute.xlu0 %838 }
0x11a8   :  { %v841_v42 = vmul.f32 %v839_v41, %v832_v39 }
0x11aa   :  { %843 = vrot.lane.b32.xlu1 %v841_v42, %s1297_s22 }
0x121c   :  { %v844_v47 = vpop.permute.xlu1 %843 }
0x121d   :  { %v846_v48 = vadd.f32 %v844_v47, %v836_v45 }
0x121f   :  { %1286 = vtanh.f32 %v846_v48  ;;  %v937_v4 = vrot.slane %v846_v48, 6 }
0x122c   :  { %v1287_v49 = vpop.eup %1286 }
0x122d   :  { %849 = vrot.lane.b32.xlu0 %v1287_v49, %s1296_s3 }
0x129f   :  { %v850_v50 = vpop.permute.xlu0 %849 }
0x12a0   :  { %v852_v51 = vmul.f32 %v850_v50, %v832_v39 }
0x12a2   :  { %v854_v53 = vrot.slane %v852_v51, 4  ;;  %v962_v54 = vsel %vm957_vm7, %v961_v52, %v852_v51 }
0x12a4   :  { %855 = vrot.lane.b32.xlu1 %v854_v53, %s1297_s22 }
0x1316   :  { %v856_v55 = vpop.permute.xlu1 %855 }
0x1317   :  { %1242 = vmatmul.mubr.msk.f32.vlgmr.msra.gmra.mxu0 %vm145_vm6, %v856_v55 }
0x13d7   :  { %v925_v36 = vpop.f32.mrf.mxu0 }
0x13d8   :  { %v930_v56 = vrot.slane %v925_v36, 2 }
0x13d9   :  { %v1243_v57 = vpop.f32.mrf.mxu0 }
0x13da   :  { %v932_v59 = vadd.f32 %v930_v56, %v1430_v40  ;;  %v1258_v40 = vld [vmem:[%s1614_s4 + $0x8] sm:$0xff]  }
0x13db   :  { %1245 = vmatpush3.bf16.msra.mxu1 %v1258_v40 }
0x13dc   :  { %1288 = vtanh.f32 %v932_v59  ;;  %1246 = vmatprep.subr.bf16.mxu1 %v1292_v0 }
0x13e9   :  { %v1289_v60 = vpop.eup %1288 }
0x13ea   :  { %v934_v61 = vmul.f32 %v1289_v60, %v1433_v44  ;;  %v1259_v44 = vld [vmem:[%s1614_s4] sm:$0xff]  }
0x13eb   :  { %1247 = vmatpush3.bf16.msra.mxu1 %v1259_v44 }
0x13ec   :  { %v935_v62 = vadd.f32 %v934_v61, %v1435_v46 }
0x13ee   :  { %941 = vrot.lane.b32.xlu0 %v935_v62, %s1296_s3  ;;  %v939_v5 = vmul.f32 %v937_v4, %v935_v62 }
0x1460   :  { %v942_v63 = vpop.permute.xlu0 %941 }
0x1461   :  { %v944_v3 = vmul.f32 %v942_v63, %v935_v62 }
0x1463   :  { %946 = vrot.lane.b32.xlu1 %v944_v3, %s1297_s22 }
0x14d5   :  { %v947_v6 = vpop.permute.xlu1 %946 }
0x14d6   :  { %v949_v7 = vadd.f32 %v947_v6, %v939_v5 }
0x14d8   :  { %1290 = vtanh.f32 %v949_v7 }
0x14e5   :  { %v1291_v46 = vpop.eup %1290 }
0x14e6   :  { %952 = vrot.lane.b32.xlu0 %v1291_v46, %s1296_s3 }
0x1558   :  { %v953_v9 = vpop.permute.xlu0 %952 }
0x1559   :  { %v955_v10 = vmul.f32 %v953_v9, %v935_v62 }
0x155b   :  { %v963_v11 = vsel %vm959_vm8, %v962_v54, %v955_v10 }
0x155c   :  { %v964_v12 = vpack.c.bf16 %v963_v11, %v1503_v58 }
0x155e   :  { %977 = vrot.lane.b32.xlu1 %v964_v12, %s1297_s22 }
0x15d0   :  { %v978_v13 = vpop.permute.xlu1 %977 }
0x15d1   :  { %1249 = vmatmul.mubr.msk.bf16.vlgmr.msra.gmra.mxu1 %vm145_vm6, %v978_v13 }
0x1691   :  { %v1028_v0 = vpop.f32.mrf.mxu1 }
0x1692   :  { %v1029_v15 = vadd.f32 %v1101_v14, %v1028_v0 }
0x1693   :  { %v1250_v16 = vpop.f32.mrf.mxu1 }
0x1694   :  { %v1037_v18 = vcombine.high %v1029_v15, %v1029_v15  ;;  %v1044_v19 = vrot.slane %v1029_v15, %v1395_v24 }
0x1695   :  { %v1031_v1 = vpop.f32.mrf.mxu1 }
0x1696   :  { %v1051_v20 = vrot.slane %v1037_v18, %v1395_v24  ;;  %v1052_v58 = vcombine.high %v1044_v19, %v1044_v19  ;;  %1080 = vst.msk [vmem:[%s1616_s6] sm:$0x3] %vm1079_vm9, %v1044_v19  ;;  %v1032_v21 = vadd.f32 %v1101_v14, %v1031_v1 }
0x1697   :  { %v1251_v22 = vpop.f32.mrf.mxu1 }
0x1698   :  { %v1053_v2 = vcombine.high %v1051_v20, %v1051_v20  ;;  %1081 = vst.msk [vmem:[%s1616_s6 + $0x2] sm:$0x3] %vm1079_vm9, %v1052_v58  ;;  %1082 = vst.msk [vmem:[%s1616_s6 + $0x4] sm:$0x3] %vm1079_vm9, %v1051_v20  ;;  %v1054_v23 = vcombine.high %v1032_v21, %v1032_v21  ;;  %v1061_v8 = vrot.slane %v1032_v21, %v1395_v24 }
0x169a   :  { %1083 = vst.msk [vmem:[%s1616_s6 + $0x6] sm:$0x3] %vm1079_vm9, %v1053_v2  ;;  %v1068_v25 = vrot.slane %v1054_v23, %v1395_v24  ;;  %v1069_v17 = vcombine.high %v1061_v8, %v1061_v8  ;;  %1084 = vst.msk [vmem:[%s1616_s6 + $0x8] sm:$0x3] %vm1079_vm9, %v1061_v8 }
0x169c   :  { %v1070_v26 = vcombine.high %v1068_v25, %v1068_v25  ;;  %1085 = vst.msk [vmem:[%s1616_s6 + $0xa] sm:$0x3] %vm1079_vm9, %v1069_v17  ;;  %1086 = vst.msk [vmem:[%s1616_s6 + $0xc] sm:$0x3] %vm1079_vm9, %v1068_v25 }
0x169e   :  { %1087 = vst.msk [vmem:[%s1616_s6 + $0xe] sm:$0x3] %vm1079_vm9, %v1070_v26 }

</bundles_post_ra>
